<compile_context>
chip_gen: v5e
topology: v5e:2x2
jax: 0.10.0
libtpu: 0.0.40
codegen_flags: <defaults>
</compile_context>

<pallas_src>
import functools
import math

import jax
import jax.numpy as jnp
from jax.experimental import pallas as pl
from jax.experimental.pallas import tpu as pltpu


# --------------------------------------------------------------------------
# Kernel
# --------------------------------------------------------------------------
def _obsnorm_kernel(x_ref, mean_ref, inv_std_ref, o_ref, *, low, high):
    # mean / inv_std are f32 (1, lane_tile) rows broadcast over the row tile.
    # inv_std is precomputed in the wrapper, so the hot loop is just
    # subtract + multiply (+ clamp) on the VPU; the kernel is HBM-bound.
    x = x_ref[...].astype(jnp.float32)
    y = (x - mean_ref[...]) * inv_std_ref[...]
    if low is not None:
        y = jnp.maximum(y, jnp.float32(low))
    if high is not None:
        y = jnp.minimum(y, jnp.float32(high))
    o_ref[...] = y.astype(o_ref.dtype)


# --------------------------------------------------------------------------
# Wrapper
# --------------------------------------------------------------------------
_TILE_BYTES = 4 * 1024 * 1024          # per-block budget for the streamed x tile
_VMEM_LIMIT_BYTES = 32 * 1024 * 1024   # ~4x tile (in+out double-buffered) + headroom
_MIN_PIPELINE_BYTES = 1 * 1024 * 1024  # below this, a single block is fine
_MIN_GRID_STEPS = 4                    # keep the DMA pipeline busy / allow 2-TC split
_MIN_PALLAS_ELEMS = 4096               # below this, launch overhead dominates


def _plain(x2, mean_row, inv_std_row, low, high):
    """Fused-XLA fallback for tiny inputs."""
    y = (x2.astype(jnp.float32) - mean_row) * inv_std_row
    if low is not None:
        y = jnp.maximum(y, jnp.float32(low))
    if high is not None:
        y = jnp.minimum(y, jnp.float32(high))
    return y.astype(x2.dtype)


def _sublane_multiple(dtype):
    # rows per vreg sublane tile: 8 for 32-bit, 16 for 16-bit, 32 for 8-bit.
    return {1: 32, 2: 16}.get(jnp.dtype(dtype).itemsize, 8)


def _choose_tiles(rows, lane, itemsize, sub, tile_rows):
    """Pick (row_tile, lane_tile) under the VMEM budget with >=4 grid steps."""
    # Lane tile: full extent unless even a (sub, lane) slab blows the budget.
    max_lane = max(128, (_TILE_BYTES // (sub * itemsize)) // 128 * 128)
    tl = lane if lane <= max_lane else max_lane
    n_lane_tiles = pl.cdiv(lane, tl)

    if tile_rows is not None:
        tb = int(tile_rows)
    else:
        budget_rows = max(sub, (_TILE_BYTES // max(1, tl * itemsize)) // sub * sub)
        total_bytes = rows * lane * itemsize
        if total_bytes >= _MIN_PIPELINE_BYTES and n_lane_tiles < _MIN_GRID_STEPS:
            # Force a few grid steps so the auto double-buffered pipeline can
            # overlap writeback / prefetch with compute (and v7x can shard the
            # parallel row axis across both TensorCores).
            want_row_steps = pl.cdiv(_MIN_GRID_STEPS, n_lane_tiles)
            depth_rows = max(sub, (rows // want_row_steps) // sub * sub)
        else:
            depth_rows = budget_rows
        tb = min(budget_rows, depth_rows)

    if tb >= rows:
        tb = rows  # full-extent block dim is always legal
    return tb, tl


def obs_norm_layer(x, mean, stdev, low=None, high=None,
                   *, use_pallas=None, tile_rows=None):
    """Pallas equivalent of ObsNormLayer.forward.

    Args:
      x:      (..., obs_dim) observation(s).
      mean:   (obs_dim,) mean buffer.
      stdev:  (obs_dim,) stdev buffer.
      low/high: optional static clamp bounds (Python floats or None).
      use_pallas: force (True/False) or auto-dispatch (None) on input size.
      tile_rows: optional override of the per-step row tile (testing knob).
    """
    low = None if low is None else float(low)
    high = None if high is None else float(high)

    orig_shape = x.shape
    obs_dim = int(x.shape[-1])
    x2 = x.reshape(-1, obs_dim)
    batch = int(x2.shape[0])

    # Stats are prepared once, in f32 (exact for f32 x; higher precision than
    # casting to bf16 when x is bf16). Reciprocal hoisted out of the kernel.
    mean_row = mean.reshape(1, obs_dim).astype(jnp.float32)
    inv_std_row = 1.0 / stdev.reshape(1, obs_dim).astype(jnp.float32)

    if use_pallas is None:
        use_pallas = batch * obs_dim >= _MIN_PALLAS_ELEMS
    if not use_pallas or batch == 0:
        return _plain(x2, mean_row, inv_std_row, low, high).reshape(orig_shape)

    # ---- lane-dense folding: fold `fold` observation rows into one row so the
    # last dim becomes a multiple of 128 (lane = lcm(obs_dim, 128)). Pure
    # layout plumbing; pad the batch when it is not a multiple of `fold`.
    fold = 128 // math.gcd(obs_dim, 128)
    pad = 0
    if fold > 1 and batch >= fold:
        pad = (-batch) % fold
        if pad * 4 > batch:          # >25% padding overhead -> not worth it
            fold, pad = 1, 0
    else:
        fold = 1

    if fold > 1:
        if pad:
            x2 = jnp.pad(x2, ((0, pad), (0, 0)))
        rows = (batch + pad) // fold
        lane = obs_dim * fold
        x_f = x2.reshape(rows, lane)
        mean_row = jnp.tile(mean_row, (1, fold))
        inv_std_row = jnp.tile(inv_std_row, (1, fold))
    else:
        rows, lane = batch, obs_dim
        x_f = x2

    itemsize = jnp.dtype(x.dtype).itemsize
    sub = _sublane_multiple(x.dtype)
    tb, tl = _choose_tiles(rows, lane, itemsize, sub, tile_rows)
    grid = (pl.cdiv(rows, tb), pl.cdiv(lane, tl))

    kernel = functools.partial(_obsnorm_kernel, low=low, high=high)
    cost = pl.CostEstimate(
        flops=4 * rows * lane,
        transcendentals=0,
        bytes_accessed=2 * rows * lane * itemsize + 8 * lane,
    )

    out = pl.pallas_call(
        kernel,
        out_shape=jax.ShapeDtypeStruct((rows, lane), x.dtype),
        grid=grid,
        in_specs=[
            pl.BlockSpec((tb, tl), lambda i, j: (i, j)),   # x tile
            pl.BlockSpec((1, tl), lambda i, j: (0, j)),    # mean row (f32)
            pl.BlockSpec((1, tl), lambda i, j: (0, j)),    # 1/stdev row (f32)
        ],
        out_specs=pl.BlockSpec((tb, tl), lambda i, j: (i, j)),
        compiler_params=pltpu.CompilerParams(
            dimension_semantics=("parallel", "parallel"),
            vmem_limit_bytes=_VMEM_LIMIT_BYTES,
        ),
        cost_estimate=cost,
    )(x_f, mean_row, inv_std_row)

    if fold > 1:
        out = out.reshape(rows * fold, obs_dim)
        if pad:
            out = out[:batch]
    return out.reshape(orig_shape)


# --------------------------------------------------------------------------
# Demo / correctness check
# --------------------------------------------------------------------------
if __name__ == "__main__":
    key = jax.random.PRNGKey(0)

    def _ref(x, mean, stdev, low, high):
        y = (x.astype(jnp.float32) - mean[None, :].astype(jnp.float32)) \
            / stdev[None, :].astype(jnp.float32)
        if low is not None:
            y = jnp.maximum(y, low)
        if high is not None:
            y = jnp.minimum(y, high)
        return y.astype(x.dtype)

    def _check(batch, obs_dim, low, high, dtype=jnp.float32,
               tile_rows=None, atol=1e-6, rtol=1e-6):
        k1, k2, k3 = jax.random.split(
            jax.random.fold_in(key, batch * 131 + obs_dim), 3)
        x = (jax.random.normal(k1, (batch, obs_dim), dtype=jnp.float32)
             * 3.0).astype(dtype)
        mean = jax.random.normal(k2, (obs_dim,), dtype=jnp.float32)
        stdev = jax.random.uniform(k3, (obs_dim,), dtype=jnp.float32,
                                   minval=0.5, maxval=2.0)
        out = jax.block_until_ready(
            obs_norm_layer(x, mean, stdev, low, high,
                           use_pallas=True, tile_rows=tile_rows))
        ref = _ref(x, mean, stdev, low, high)
        assert out.shape == x.shape and out.dtype == x.dtype, (batch, obs_dim)
        assert jnp.allclose(out.astype(jnp.float32), ref.astype(jnp.float32),
                            atol=atol, rtol=rtol), (batch, obs_dim, str(dtype))

    # 1) original small case: obs_dim=32 folds 4x into 128 lanes, single block.
    _check(batch=8, obs_dim=32, low=-2.0, high=2.0)
    # 2) forced small row tile -> multi-step pipelined grid path.
    _check(batch=64, obs_dim=32, low=-1.5, high=1.5, tile_rows=8)
    # 3) obs_dim=160 -> generalized fold (x4 -> lane=640), no clamp.
    _check(batch=16, obs_dim=160, low=None, high=None)
    # 4) batch not a multiple of the fold factor -> padded fold path.
    _check(batch=20, obs_dim=48, low=-3.0, high=3.0)
    # 5) bf16 observations: compute in f32, store bf16.
    _check(batch=32, obs_dim=32, low=-2.0, high=2.0, dtype=jnp.bfloat16,
           atol=2e-2, rtol=2e-2)

    print("KERNEL_OK")
</pallas_src>

<mosaic_0001>
module attributes {stable_mosaic.version = 11 : i64} {
  func.func @_obsnorm_kernel(%arg0: i32, %arg1: i32, %arg2: memref<2x128xf32, #tpu.memory_space<vmem>>, %arg3: memref<1x128xf32, #tpu.memory_space<vmem>>, %arg4: memref<1x128xf32, #tpu.memory_space<vmem>>, %arg5: memref<2x128xf32, #tpu.memory_space<vmem>>) attributes {dimension_semantics = [#tpu.dimension_semantics<parallel>, #tpu.dimension_semantics<parallel>], iteration_bounds = array<i64: 1, 1>, scalar_prefetch = 0 : i64, scratch_operands = 0 : i64, tpu.core_type = #tpu.core_type<tc>, window_params = [{transform_indices = @transform_0, window_bounds = array<i64: 2, 128>}, {transform_indices = @transform_1, window_bounds = array<i64: 1, 128>}, {transform_indices = @transform_2, window_bounds = array<i64: 1, 128>}, {transform_indices = @transform_3, window_bounds = array<i64: 2, 128>}]} {
    %c0 = arith.constant 0 : index
    %c0_0 = arith.constant 0 : index
    %0 = vector.load %arg2[%c0, %c0_0] : memref<2x128xf32, #tpu.memory_space<vmem>>, vector<2x128xf32>
    %c0_1 = arith.constant 0 : index
    %c0_2 = arith.constant 0 : index
    %1 = vector.load %arg3[%c0_1, %c0_2] : memref<1x128xf32, #tpu.memory_space<vmem>>, vector<1x128xf32>
    %2 = vector.broadcast %1 : vector<1x128xf32> to vector<2x128xf32>
    %3 = arith.subf %0, %2 : vector<2x128xf32>
    %c0_3 = arith.constant 0 : index
    %c0_4 = arith.constant 0 : index
    %4 = vector.load %arg4[%c0_3, %c0_4] : memref<1x128xf32, #tpu.memory_space<vmem>>, vector<1x128xf32>
    %5 = vector.broadcast %4 : vector<1x128xf32> to vector<2x128xf32>
    %6 = arith.mulf %3, %5 : vector<2x128xf32>
    %cst = arith.constant -2.000000e+00 : f32
    %7 = vector.broadcast %cst : f32 to vector<2x128xf32>
    %8 = arith.maximumf %6, %7 : vector<2x128xf32>
    %cst_5 = arith.constant 2.000000e+00 : f32
    %9 = vector.broadcast %cst_5 : f32 to vector<2x128xf32>
    %10 = arith.minimumf %8, %9 : vector<2x128xf32>
    %c0_6 = arith.constant 0 : index
    %c0_7 = arith.constant 0 : index
    %11 = vector.load %arg5[%c0_6, %c0_7] : memref<2x128xf32, #tpu.memory_space<vmem>>, vector<2x128xf32>
    tpu.vector_store %arg5[%c0_6, %c0_7], %10 {strides = array<i32>} : memref<2x128xf32, #tpu.memory_space<vmem>>, vector<2x128xf32>,
    return
  }
  func.func @transform_0(%arg0: i32, %arg1: i32) -> (i32, i32) {
    %c0_i32 = arith.constant 0 : i32
    return %arg0, %arg1 : i32, i32
  }
  func.func @transform_1(%arg0: i32, %arg1: i32) -> (i32, i32) {
    %c0_i32 = arith.constant 0 : i32
    %c0_i32_0 = arith.constant 0 : i32
    return %c0_i32, %arg1 : i32, i32
  }
  func.func @transform_2(%arg0: i32, %arg1: i32) -> (i32, i32) {
    %c0_i32 = arith.constant 0 : i32
    %c0_i32_0 = arith.constant 0 : i32
    return %c0_i32, %arg1 : i32, i32
  }
  func.func @transform_3(%arg0: i32, %arg1: i32) -> (i32, i32) {
    %c0_i32 = arith.constant 0 : i32
    return %arg0, %arg1 : i32, i32
  }
}

</mosaic_0001>

<bundles_post_ra>
// kernel: tpu_custom_call.1
= control target key start
LH: loop header
LB: loop body
LE: loop exit
PB: predicated region body
PF: predicated region fallthrough
CT: control target
= control target key end

     0   :  { %8 = vsyncpa [#allocation3], 0  ;;  %s194_s0 = inlined_call_operand.hbm [shape: f32[2,128], index: 0, kind: input, shape index: {}]   ;;  %s195_s1 = inlined_call_operand.hbm [shape: f32[1,128], index: 1, kind: input, shape index: {}]   ;;  %s196_s2 = inlined_call_operand.vmem [shape: f32[1,128], index: 2, kind: input, shape index: {}]   ;;  %s197_s3 = inlined_call_operand.hbm [shape: f32[2,128], index: 3, kind: output, shape index: {}]  }
   0x1   :  { %9 = vsyncpa [#allocation6], 0 }
   0x2   :  { %10 = vsyncpa [#allocation4], 0  ;;  %s16_s14 = sshll.u32 %s194_s0, 4  ;;  %s159_s15 = smov [#allocation2]   ;;  %s17_s14 = int_to_ptr.hbm [resolvable:$true] %s16_s14 }
   0x3   :  { %s18_s16 = sshll.u32 %s159_s15, 4  ;;  %s27_s19 = sshll.u32 %s195_s1, 4  ;;  %s19_s16 = int_to_ptr.vmem [resolvable:$true] %s18_s16  ;;  %s28_s19 = int_to_ptr.hbm [resolvable:$true] %s27_s19 }
   0x4   :  { %21 = dma.hbm_to_vmem [thread:$0]  %s17_s14, 32, %s19_s16, [#allocation3]  }
   0x5   :  { %s160_s20 = smov [#allocation5]  }
   0x6   :  { %s29_s21 = sshll.u32 %s160_s20, 4  ;;  %s30_s21 = int_to_ptr.vmem [resolvable:$true] %s29_s21 }
   0x7   :  { %32 = dma.hbm_to_vmem [thread:$0]  %s28_s19, 16, %s30_s21, [#allocation6]  }
   0x8   :  { %153 = dma.done.wait [#allocation3], 32  }
   0x9   :  { %154 = vsyncadd [#allocation3], 4294967264 }
   0xa   :  { %155 = dma.done.wait [#allocation6], 16  }
   0xb   :  { %156 = vsyncadd [#allocation6], 4294967280  ;;  %v43_v0 = vld [vmem:[#allocation2] sm:$0x3]  ;;  %v79_v1 = vld [vmem:[#allocation5] ss:$0 sm:$0xff] }
   0xc   :  { %v80_v2 = vld [vmem:[%s196_s2] ss:$0 sm:$0xff]  ;;  %v48_v3 = vsub.f32 %v43_v0, %v79_v1  ;;  %s161_s23 = smov [#allocation7]   ;;  %s64_s26 = sshll.u32 %s197_s3, 4  ;;  %s65_s26 = int_to_ptr.hbm [resolvable:$true] %s64_s26 }
   0xd   :  { %s62_s24 = sshll.u32 %s161_s23, 4  ;;  %s63_s24 = int_to_ptr.vmem [resolvable:$true] %s62_s24 }
   0xe   :  { %v53_v4 = vmul.f32 %v80_v2, %v48_v3 }
  0x10   :  { %v75_v5 = vclamps-f32 %v53_v4, 2.0 }
  0x12   :  { %56 = vst [vmem:[#allocation7] sm:$0x3] %v75_v5 }
  0x13   :  { %67 = dma.vmem_to_hbm [thread:$0]  %s63_s24, 32, %s65_s26, [#allocation4]  }
  0x14   :  { %157 = dma.done.wait [#allocation4], 32  }
  0x15   :  { %158 = vsyncadd [#allocation4], 4294967264 }
  0x16   :  { %72 = vsyncpa [#allocation3], 1 }
  0x17   :  { %73 = vsyncpa [#allocation6], 1 }
  0x18   :  { %74 = vsyncpa [#allocation4], 1 }

</bundles_post_ra>
